<compile_context>
chip_gen: v7x
topology: tpu7x:2x2x1
jax: 0.10.0
libtpu: 0.0.40
codegen_flags: <defaults>
</compile_context>

<pallas_src>
import jax
import jax.numpy as jnp
from jax import lax
from jax.experimental import pallas as pl
from jax.experimental.pallas import tpu as pltpu


def _disc_kernel(z_ref, w1_ref, b1_ref, w2_ref, b2_ref, w3_ref, b3_ref, out_ref):
    z = z_ref[...]                                            # (tb, dim_z)

    # Layer 1: Linear + LeakyReLU(0.2); f32 accumulation on the MXU.
    h1 = jnp.dot(z, w1_ref[...], preferred_element_type=jnp.float32) + b1_ref[...]
    h1 = jnp.maximum(h1, 0.2 * h1)

    # Layer 2: Linear + LeakyReLU(0.2).
    h2 = (jnp.dot(h1.astype(w2_ref.dtype), w2_ref[...],
                  preferred_element_type=jnp.float32) + b2_ref[...])
    h2 = jnp.maximum(h2, 0.2 * h2)

    # Layer 3 (single output feature), lane-dense [1, tb]:
    # fold the transpose into the contraction (contract dim 1 of both
    # operands) instead of materializing h2.T through the XLU.
    h3 = lax.dot_general(
        w3_ref[...], h2.astype(w3_ref.dtype),
        dimension_numbers=(((1,), (1,)), ((), ())),
        preferred_element_type=jnp.float32) + b3_ref[0]       # (1, tb)

    # Exact sigmoid (output may feed a training loss); exp goes to the EUP,
    # the divide is free in this mem-bound kernel.
    sig = 1.0 / (1.0 + jnp.exp(-h3))
    out_ref[...] = sig[None].astype(out_ref.dtype)            # (1, 1, tb)


def pack_params(params, *, dtype=None):
    """One-time conversion of PyTorch-convention params to kernel layout.

    Hoisted out of the forward so no per-call transposes / casts are emitted.
    Optionally pre-cast the weight matrices to `dtype` (e.g. jnp.bfloat16 when
    z arrives in bf16 from the producer); biases stay f32.
    """
    w1 = jnp.asarray(params["w1"]).T                          # (dim_z, dim_h)
    w2 = jnp.asarray(params["w2"]).T                          # (dim_h, dim_h//2)
    w3 = jnp.asarray(params["w3"]).reshape(1, -1)             # (1, dim_h//2)
    if dtype is not None:
        w1, w2, w3 = w1.astype(dtype), w2.astype(dtype), w3.astype(dtype)
    return {
        "w1": w1,
        "b1": jnp.asarray(params["b1"]).reshape(1, -1).astype(jnp.float32),
        "w2": w2,
        "b2": jnp.asarray(params["b2"]).reshape(1, -1).astype(jnp.float32),
        "w3": w3,
        "b3": jnp.asarray(params["b3"]).reshape(-1).astype(jnp.float32),  # (1,) SMEM
    }


def discriminator_forward(z, packed, *, block_b=4096):
    """z: [B, dim_z] (any float dtype — no wrapper cast). Returns [B, 1] f32."""
    B, dim_z = z.shape
    w1, b1 = packed["w1"], packed["b1"]
    w2, b2 = packed["w2"], packed["b2"]
    w3, b3 = packed["w3"], packed["b3"]
    dim_h = w1.shape[1]
    dim_h2 = w2.shape[1]

    # Sublane granule depends on input packing: 8 rows/vreg f32, 16 bf16, 32 i8.
    itemsize = jnp.dtype(z.dtype).itemsize
    granule = {4: 8, 2: 16, 1: 32}.get(itemsize, 8)

    # Large tiles amortize per-grid-step overhead; cap at cdiv(B, 2) so that
    # (when B is large enough) there are >= 2 grid steps for v7x's two TCs.
    tb = min(block_b, pl.cdiv(B, 2))
    tb = max(granule, ((tb + granule - 1) // granule) * granule)
    num_tiles = pl.cdiv(B, tb)          # no jnp.pad: partial last tile is fine,
                                        # rows >= B are independent & sliced off.

    def const(shape):
        return pl.BlockSpec(shape, lambda i: (0,) * len(shape))

    # VMEM budget: double-buffered z/out streams + resident weights + per-step
    # activations; clamp to [32 MiB, 48 MiB] (safe on all gens incl. v7x 64 MiB).
    w_itemsize = jnp.dtype(w1.dtype).itemsize
    stream = 2 * (tb * dim_z * itemsize + tb * 4)
    weights = ((dim_z * dim_h + dim_h * dim_h2 + dim_h2) * w_itemsize
               + (dim_h + dim_h2 + 1) * 4)
    activ = 2 * tb * (dim_h + dim_h2) * 4
    vmem_limit = int(min(max(2 * (stream + weights + activ), 32 << 20), 48 << 20))

    flops = 2 * B * (dim_z * dim_h + dim_h * dim_h2 + dim_h2)
    bytes_accessed = int(B * dim_z * itemsize + weights + B * 4)

    out = pl.pallas_call(
        _disc_kernel,
        out_shape=jax.ShapeDtypeStruct((num_tiles, 1, tb), jnp.float32),
        grid=(num_tiles,),
        in_specs=[
            pl.BlockSpec((tb, dim_z), lambda i: (i, 0)),       # z: batch-tiled
            const((dim_z, dim_h)), const((1, dim_h)),          # w1, b1 resident
            const((dim_h, dim_h2)), const((1, dim_h2)),        # w2, b2 resident
            const((1, dim_h2)),                                 # w3 row resident
            pl.BlockSpec(memory_space=pltpu.MemorySpace.SMEM),  # b3 scalar
        ],
        out_specs=pl.BlockSpec((1, 1, tb), lambda i: (i, 0, 0)),
        compiler_params=pltpu.CompilerParams(
            dimension_semantics=("parallel",),
            vmem_limit_bytes=vmem_limit),
        cost_estimate=pl.CostEstimate(
            flops=flops, transcendentals=B, bytes_accessed=bytes_accessed),
    )(z, w1, b1, w2, b2, w3, b3)

    return out.reshape(num_tiles * tb, 1)[:B]


def init_params(key, dim_z, dim_h):
    """Deterministic synthetic init mirroring the PyTorch Linear shapes."""
    k = jax.random.split(key, 6)

    def lin(kw, kb, fan_in, fan_out):
        bound = 1.0 / jnp.sqrt(fan_in)
        w = jax.random.uniform(kw, (fan_out, fan_in), jnp.float32, -bound, bound)
        b = jax.random.uniform(kb, (fan_out,), jnp.float32, -bound, bound)
        return w, b

    w1, b1 = lin(k[0], k[1], dim_z, dim_h)
    w2, b2 = lin(k[2], k[3], dim_h, dim_h // 2)
    w3, b3 = lin(k[4], k[5], dim_h // 2, 1)
    return {"w1": w1, "b1": b1, "w2": w2, "b2": b2, "w3": w3, "b3": b3}


def reference_forward(z, params):
    h1 = z @ params["w1"].T + params["b1"]
    h1 = jnp.where(h1 > 0, h1, 0.2 * h1)
    h2 = h1 @ params["w2"].T + params["b2"]
    h2 = jnp.where(h2 > 0, h2, 0.2 * h2)
    h3 = h2 @ params["w3"].T + params["b3"]
    return jax.nn.sigmoid(h3)


if __name__ == "__main__":
    dim_z, dim_h, batch = 16, 32, 8
    key = jax.random.PRNGKey(0)
    kz, kp = jax.random.split(key)
    z = jax.random.normal(kz, (batch, dim_z), jnp.float32)
    params = init_params(kp, dim_z, dim_h)
    packed = pack_params(params)

    # f32 path (single-tile grid at this tiny batch).
    out = jax.block_until_ready(discriminator_forward(z, packed))
    ref = reference_forward(z, params)
    assert out.shape == (batch, 1)
    assert jnp.allclose(out, ref, atol=1e-4, rtol=1e-4), "f32 mismatch vs reference"

    # Multi-tile grid with a ragged last tile (no wrapper-side padding of z).
    z_big = jax.random.normal(kz, (300, dim_z), jnp.float32)
    out_big = jax.block_until_ready(
        discriminator_forward(z_big, packed, block_b=128))
    ref_big = reference_forward(z_big, params)
    assert out_big.shape == (300, 1)
    assert jnp.allclose(out_big, ref_big, atol=1e-4, rtol=1e-4), "tiled mismatch"

    # bf16 path: z already arrives in bf16 from the producer, weights pre-cast
    # once in pack_params (valid on v5e/v6e/v7x; accumulation stays f32).
    z_bf16 = z.astype(jnp.bfloat16)               # one-time at the "source"
    packed_bf16 = pack_params(params, dtype=jnp.bfloat16)
    out_bf16 = jax.block_until_ready(discriminator_forward(z_bf16, packed_bf16))
    ref_bf16 = reference_forward(z_bf16.astype(jnp.float32), params)
    assert out_bf16.shape == (batch, 1)
    assert jnp.allclose(out_bf16, ref_bf16, atol=5e-2, rtol=5e-2), "bf16 mismatch"

    print("KERNEL_OK")
</pallas_src>

<mosaic_0001>
module attributes {stable_mosaic.version = 11 : i64} {
  func.func @_disc_kernel(%arg0: i32, %arg1: memref<8x16xf32, #tpu.memory_space<vmem>>, %arg2: memref<16x32xf32, #tpu.memory_space<vmem>>, %arg3: memref<1x32xf32, #tpu.memory_space<vmem>>, %arg4: memref<32x16xf32, #tpu.memory_space<vmem>>, %arg5: memref<1x16xf32, #tpu.memory_space<vmem>>, %arg6: memref<1x16xf32, #tpu.memory_space<vmem>>, %arg7: memref<1xf32, #tpu.memory_space<smem>>, %arg8: memref<1x1x8xf32, #tpu.memory_space<vmem>>) attributes {dimension_semantics = [#tpu.dimension_semantics<parallel>], iteration_bounds = array<i64: 1>, scalar_prefetch = 0 : i64, scratch_operands = 0 : i64, tpu.core_type = #tpu.core_type<tc>, window_params = [{transform_indices = @transform_0, window_bounds = array<i64: 8, 16>}, {pipeline_mode = #tpu.pipeline_mode<synchronous>, transform_indices = @transform_1, window_bounds = array<i64: 16, 32>}, {pipeline_mode = #tpu.pipeline_mode<synchronous>, transform_indices = @transform_2, window_bounds = array<i64: 1, 32>}, {pipeline_mode = #tpu.pipeline_mode<synchronous>, transform_indices = @transform_3, window_bounds = array<i64: 32, 16>}, {pipeline_mode = #tpu.pipeline_mode<synchronous>, transform_indices = @transform_4, window_bounds = array<i64: 1, 16>}, {pipeline_mode = #tpu.pipeline_mode<synchronous>, transform_indices = @transform_5, window_bounds = array<i64: 1, 16>}, {transform_indices = @transform_6, window_bounds = array<i64: 1>}, {transform_indices = @transform_7, window_bounds = array<i64: 1, 1, 8>}]} {
    %c0 = arith.constant 0 : index
    %c0_0 = arith.constant 0 : index
    %0 = vector.load %arg1[%c0, %c0_0] : memref<8x16xf32, #tpu.memory_space<vmem>>, vector<8x16xf32>
    %c0_1 = arith.constant 0 : index
    %c0_2 = arith.constant 0 : index
    %1 = vector.load %arg2[%c0_1, %c0_2] : memref<16x32xf32, #tpu.memory_space<vmem>>, vector<16x32xf32>
    %cst = arith.constant dense<0.000000e+00> : vector<8x32xf32>
    %2 = tpu.matmul %0, %1, %cst {dimension_numbers = #tpu.dot_dimension_numbers<[1], [0], [0], [1], [0, 0, 1, 1], [], []>} : vector<8x16xf32>, vector<16x32xf32>, vector<8x32xf32> -> vector<8x32xf32>
    %c0_3 = arith.constant 0 : index
    %c0_4 = arith.constant 0 : index
    %3 = vector.load %arg3[%c0_3, %c0_4] : memref<1x32xf32, #tpu.memory_space<vmem>>, vector<1x32xf32>
    %4 = vector.broadcast %3 : vector<1x32xf32> to vector<8x32xf32>
    %5 = arith.addf %2, %4 : vector<8x32xf32>
    %cst_5 = arith.constant 2.000000e-01 : f32
    %6 = vector.broadcast %cst_5 : f32 to vector<8x32xf32>
    %7 = arith.mulf %6, %5 : vector<8x32xf32>
    %8 = arith.maximumf %5, %7 : vector<8x32xf32>
    %c0_6 = arith.constant 0 : index
    %c0_7 = arith.constant 0 : index
    %9 = vector.load %arg4[%c0_6, %c0_7] : memref<32x16xf32, #tpu.memory_space<vmem>>, vector<32x16xf32>
    %cst_8 = arith.constant dense<0.000000e+00> : vector<8x16xf32>
    %10 = tpu.matmul %8, %9, %cst_8 {dimension_numbers = #tpu.dot_dimension_numbers<[1], [0], [0], [1], [0, 0, 1, 1], [], []>} : vector<8x32xf32>, vector<32x16xf32>, vector<8x16xf32> -> vector<8x16xf32>
    %c0_9 = arith.constant 0 : index
    %c0_10 = arith.constant 0 : index
    %11 = vector.load %arg5[%c0_9, %c0_10] : memref<1x16xf32, #tpu.memory_space<vmem>>, vector<1x16xf32>
    %12 = vector.broadcast %11 : vector<1x16xf32> to vector<8x16xf32>
    %13 = arith.addf %10, %12 : vector<8x16xf32>
    %cst_11 = arith.constant 2.000000e-01 : f32
    %14 = vector.broadcast %cst_11 : f32 to vector<8x16xf32>
    %15 = arith.mulf %14, %13 : vector<8x16xf32>
    %16 = arith.maximumf %13, %15 : vector<8x16xf32>
    %c0_12 = arith.constant 0 : index
    %c0_13 = arith.constant 0 : index
    %17 = vector.load %arg6[%c0_12, %c0_13] : memref<1x16xf32, #tpu.memory_space<vmem>>, vector<1x16xf32>
    %cst_14 = arith.constant dense<0.000000e+00> : vector<1x8xf32>
    %18 = tpu.matmul %17, %16, %cst_14 {dimension_numbers = #tpu.dot_dimension_numbers<[1], [1], [0], [0], [0, 0, 1, 0], [], []>} : vector<1x16xf32>, vector<8x16xf32>, vector<1x8xf32> -> vector<1x8xf32>
    %c0_15 = arith.constant 0 : index
    %19 = memref.load %arg7[%c0_15] : memref<1xf32, #tpu.memory_space<smem>>
    %20 = vector.broadcast %19 : f32 to vector<1x8xf32>
    %21 = arith.addf %18, %20 : vector<1x8xf32>
    %cst_16 = arith.constant 0.000000e+00 : f32
    %22 = vector.broadcast %cst_16 : f32 to vector<1x8xf32>
    %23 = arith.subf %22, %21 : vector<1x8xf32>
    %24 = math.exp %23 : vector<1x8xf32>
    %cst_17 = arith.constant 1.000000e+00 : f32
    %25 = vector.broadcast %cst_17 : f32 to vector<1x8xf32>
    %26 = arith.addf %25, %24 : vector<1x8xf32>
    %cst_18 = arith.constant 1.000000e+00 : f32
    %27 = vector.broadcast %cst_18 : f32 to vector<1x8xf32>
    %28 = arith.divf %27, %26 : vector<1x8xf32>
    %29 = vector.shape_cast %28 : vector<1x8xf32> to vector<1x1x8xf32>
    %c0_19 = arith.constant 0 : index
    %c0_20 = arith.constant 0 : index
    %c0_21 = arith.constant 0 : index
    %30 = vector.load %arg8[%c0_19, %c0_20, %c0_21] : memref<1x1x8xf32, #tpu.memory_space<vmem>>, vector<1x1x8xf32>
    tpu.vector_store %arg8[%c0_19, %c0_20, %c0_21], %29 {strides = array<i32>} : memref<1x1x8xf32, #tpu.memory_space<vmem>>, vector<1x1x8xf32>,
    return
  }
  func.func @transform_0(%arg0: i32) -> (i32, i32) {
    %c0_i32 = arith.constant 0 : i32
    %c0_i32_0 = arith.constant 0 : i32
    return %arg0, %c0_i32 : i32, i32
  }
  func.func @transform_1(%arg0: i32) -> (i32, i32) {
    %c0_i32 = arith.constant 0 : i32
    %c0_i32_0 = arith.constant 0 : i32
    %c0_i32_1 = arith.constant 0 : i32
    return %c0_i32, %c0_i32_0 : i32, i32
  }
  func.func @transform_2(%arg0: i32) -> (i32, i32) {
    %c0_i32 = arith.constant 0 : i32
    %c0_i32_0 = arith.constant 0 : i32
    %c0_i32_1 = arith.constant 0 : i32
    return %c0_i32, %c0_i32_0 : i32, i32
  }
  func.func @transform_3(%arg0: i32) -> (i32, i32) {
    %c0_i32 = arith.constant 0 : i32
    %c0_i32_0 = arith.constant 0 : i32
    %c0_i32_1 = arith.constant 0 : i32
    return %c0_i32, %c0_i32_0 : i32, i32
  }
  func.func @transform_4(%arg0: i32) -> (i32, i32) {
    %c0_i32 = arith.constant 0 : i32
    %c0_i32_0 = arith.constant 0 : i32
    %c0_i32_1 = arith.constant 0 : i32
    return %c0_i32, %c0_i32_0 : i32, i32
  }
  func.func @transform_5(%arg0: i32) -> (i32, i32) {
    %c0_i32 = arith.constant 0 : i32
    %c0_i32_0 = arith.constant 0 : i32
    %c0_i32_1 = arith.constant 0 : i32
    return %c0_i32, %c0_i32_0 : i32, i32
  }
  func.func @transform_6(%arg0: i32) -> i32 {
    %c0_i32 = arith.constant 0 : i32
    %c0_i32_0 = arith.constant 0 : i32
    return %c0_i32 : i32
  }
  func.func @transform_7(%arg0: i32) -> (i32, i32, i32) {
    %c0_i32 = arith.constant 0 : i32
    %c0_i32_0 = arith.constant 0 : i32
    %c0_i32_1 = arith.constant 0 : i32
    return %arg0, %c0_i32, %c0_i32_0 : i32, i32, i32
  }
}

</mosaic_0001>

<bundles_post_ra>
// kernel: tpu_custom_call.1
= control target key start
LH: loop header
LB: loop body
LE: loop exit
PB: predicated region body
PF: predicated region fallthrough
CT: control target
= control target key end

     0   :  { %v382_v2 = vmov 0.0|0.0   ;;  %vm383_vm0 = vmmov 0   ;;  %v384_v4 = vmov 0.0   ;;  %s474_s0 = inlined_call_operand.vmem [shape: f32[8,16], index: 0, kind: input, shape index: {}]   ;;  %s475_s1 = inlined_call_operand.vmem [shape: f32[16,32], index: 1, kind: input, shape index: {}]   ;;  %s476_s2 = inlined_call_operand.vmem [shape: f32[1,32], index: 2, kind: input, shape index: {}]   ;;  %s477_s3 = inlined_call_operand.vmem [shape: f32[32,16], index: 3, kind: input, shape index: {}]   ;;  %s478_s4 = inlined_call_operand.vmem [shape: f32[1,16], index: 4, kind: input, shape index: {}]   ;;  %s479_s5 = inlined_call_operand.vmem [shape: f32[1,16], index: 5, kind: input, shape index: {}]   ;;  %s480_s6 = inlined_call_operand.<no memory space> [shape: f32[1], index: 6, kind: input, shape index: {}]   ;;  %s481_s7 = inlined_call_operand.hbm [shape: f32[1,1,8], index: 7, kind: output, shape index: {}]  }
   0x1   :  { %v29_v0 = vld [vmem:[%s475_s1] sm:$0xff]  ;;  %v30_v1 = vld [vmem:[%s475_s1 + $0x8] sm:$0xff]  ;;  %341 = vmatprep.subr.bf16.mxu0 %v382_v2  ;;  %322 = vmatprep.mubr.msk.f32.mxu0 %vm383_vm0, %v384_v4 }
   0x2   :  { %v342_v3 = vpack.c.bf16 %v30_v1, %v29_v0 }
   0x3   :  { %13 = vsyncpa [#allocation4], 0  ;;  %344 = vmatprep.subr.bf16.mxu1 %v382_v2  ;;  %333 = vmatprep.mubr.msk.f32.mxu1 %vm383_vm0, %v384_v4  ;;  %v28_v5 = vld [vmem:[%s474_s0] sm:$0xff]  ;;  %vm38_vm1 = vcmask 130048   ;;  %v115_v7 = vld [vmem:[%s477_s3 + $0x8] sm:$0xff]  ;;  %vm125_vm2 = vcmask 261120   ;;  %v203_v25 = vstv %s480_s6 }
   0x4   :  { %343 = vmatpush3.bf16.msra.mxu0 %v342_v3  ;;  %v114_v6 = vld [vmem:[%s477_s3] sm:$0xff]  ;;  %v116_v9 = vld [vmem:[%s477_s3 + $0x10] sm:$0xff]  ;;  %v117_v10 = vld [vmem:[%s477_s3 + $0x18] sm:$0xff]  ;;  %vm286_vm3 = vcmask 57344  }
   0x5   :  { %336 = vmatprep.subr.mxu0 %v384_v4  ;;  %v345_v8 = vpack.c.bf16 %v115_v7, %v114_v6  ;;  %v348_v11 = vpack.c.bf16 %v117_v10, %v116_v9  ;;  %v302_v12 = vld [vmem:[%s476_s2] ss:$0 sm:$0xff] }
   0x6   :  { %v304_v18 = vld [vmem:[%s478_s4] ss:$0 sm:$0xff]  ;;  %s385_s4 = smov [#allocation3]  }
   0x7   :  { %323 = vmatmul.mubr.msk.f32.vlgmr.msra.gmra.mrb[0].mxu0 %vm38_vm1, %v28_v5  ;;  %346 = vmatpush3.bf16.msra.mxu1 %v345_v8  ;;  %v201_v24 = vld [vmem:[%s479_s5] sm:$0x1]  ;;  %s294_s19 = sshll.u32 %s385_s4, 4  ;;  %s295_s19 = int_to_ptr.vmem [resolvable:$true] %s294_s19 }
   0x8   :  { %338 = vmatprep.mubr.msk.f32.mxu0 %vm383_vm0, %v384_v4  ;;  %347 = vmatprep.subr.bf16.mxu1 %v382_v2  ;;  %s358_s5 = scalar_lea.vmem %s295_s19, 16  ;;  %s362_s20 = scalar_lea.vmem %s295_s19, 32 }
   0x9   :  { %p359_p0 = scmp.ne.s32.totalorder %s295_s19, %s358_s5  ;;  %p363_p1 = scmp.lt.s32.totalorder %s295_s19, %s295_s19 }
   0xa   :  { %p364_p2 = scmp.lt.s32.totalorder %s362_s20, %s358_s5 }
   0xb   :  { %349 = vmatpush3.bf16.msra.mxu1 %v348_v11 }
   0xc   :  { %p365_p3 = por %p364_p2, %p363_p1 }
   0xe   :  { %p366_p4 = pnand %p365_p3, %p359_p0 }
  0xda   :  { %v108_v13 = vpop.f32.mrb[0].mxu0 }
  0xdb   :  { %v109_v14 = vadd.f32 %v302_v12, %v108_v13  ;;  %v324_v15 = vpop.f32.mrb[1].mxu0 }
  0xdd   :  { %v112_v16 = vmul.f32 0.2, %v109_v14 }
  0xdf   :  { %v113_v17 = vmax.f32 %v109_v14, %v112_v16 }
  0xe1   :  { %334 = vmatmul.mubr.msk.f32.vlgmr.msra.gmra.mrb[0].mxu1 %vm125_vm2, %v113_v17 }
 0x1b4   :  { %v195_v19 = vpop.f32.mrb[0].mxu1 }
 0x1b5   :  { %v196_v20 = vadd.f32 %v304_v18, %v195_v19  ;;  %v335_v21 = vpop.f32.mrb[1].mxu1 }
 0x1b7   :  { %v199_v22 = vmul.f32 0.2, %v196_v20 }
 0x1b9   :  { %v200_v23 = vmax.f32 %v196_v20, %v199_v22 }
 0x1bb   :  { %337 = vmatpush3.xpose.msk.msra.mxu0 %vm38_vm1, %v200_v23 }
 0x1be   :  { %339 = vmatmul.mubr.msk.f32.vlgmr.msra.gmra.mrb[2].mxu0 %vm38_vm1, %v201_v24 }
 0x291   :  { %v276_v26 = vpop.f32.mrb[2].mxu0 }
 0x292   :  { %v277_v27 = vadd.f32 %v276_v26, %v203_v25  ;;  %v340_v28 = vpop.f32.mrb[3].mxu0 }
 0x294   :  { %v280_v29 = vsub.f32 0.0, %v277_v27 }
 0x296   :  { %v281_v30 = vmul.f32 1.442695, %v280_v29 }
 0x298   :  { %354 = vpow2.f32 %v281_v30 }
 0x2a2   :  { %v355_v31 = vpop.eup %354 }
 0x2a3   :  { %v283_v32 = vadd.f32 1.0, %v355_v31 }
 0x2a5   :  { %356 = vrcp.f32 %v283_v32 }
 0x2af   :  { %v357_v33 = vpop.eup %356 }
 0x2b0   :  { %287 = vst.msk [vmem:[#allocation3] sm:$0x1] %vm286_vm3, %v357_v33 }
 0x2b1   :  { %369 = shalt.err (!%p366_p4)
}
 0x2b2   :  { %s370_s22 = scalar_lea.hbm %s481_s7, 16 }
 0x2b3   :  { %p371_p5 = scmp.ne.s32.totalorder %s481_s7, %s370_s22  ;;  %p374_p6 = scmp.lt.u32.totalorder %s370_s22, %s481_s7 }
 0x2b5   :  { %p376_p7 = pnand %p374_p6, %p371_p5 }
 0x2b7   :  { %379 = shalt.err (!%p376_p7)
}
 0x2b8   :  { %297 = dma.vmem_to_hbm [thread:$0]  %s295_s19, 16, %s481_s7, [#allocation4]  }
 0x2b9   :  { %380 = dma.done.wait [#allocation4], 16  }
 0x2ba   :  { %381 = vsyncadd [#allocation4], 4294967280 }
 0x2bb   :  { %301 = vsyncpa [#allocation4], 1 }

</bundles_post_ra>
